<compile_context>
chip_gen: v6e
topology: v6e:2x2x1
jax: 0.10.0
libtpu: 0.0.40
codegen_flags: <defaults>
</compile_context>

<pallas_src>
import jax
import jax.numpy as jnp
from jax.experimental import pallas as pl
from jax.experimental.pallas import tpu as pltpu


def _round_up(a, b):
    return ((a + b - 1) // b) * b


def _classifier_kernel(x_ref, w_ref, b_ref, mask_ref, out_ref):
    # x_ref:    (tile_m, H)   native dtype (streamed)
    # w_ref:    (1, H)        x's dtype   (resident across the grid)
    # b_ref:    (1, 1)        float32     (resident across the grid)
    # mask_ref: (1, tile_m)   float32     (lane-dense, streamed)
    # out_ref:  (1, tile_m)   float32     (lane-dense, streamed)
    #
    # (1, H) x (tile_m, H)^T -> (1, tile_m): contract the two lane axes so the
    # MXU result is already lane-dense (no N=1 column-vector epilogue).
    h = jax.lax.dot_general(
        w_ref[...], x_ref[...],
        dimension_numbers=(((1,), (1,)), ((), ())),
        preferred_element_type=jnp.float32)            # (1, tile_m) f32
    out_ref[...] = jax.nn.sigmoid(h + b_ref[...]) * mask_ref[...]


def classifier_forward(x, mask_cls, weight, bias):
    """x: [B, S, H] (f32 or bf16), mask_cls: [B, S] (any numeric/bool dtype),
    weight: [1, H] (PyTorch nn.Linear layout), bias: [1].
    Returns sent_scores: [B, S] float32."""
    B, S, H = x.shape
    M = B * S

    x_flat = x.reshape(M, H)                            # streamed in native dtype
    w_row = weight.reshape(1, H).astype(x_flat.dtype)   # lane-dense resident weight
    b = bias.astype(jnp.float32).reshape(1, 1)

    itemsize = jnp.dtype(x_flat.dtype).itemsize
    lane_h = _round_up(H, 128)                          # minor dim is lane-padded in HBM/VMEM
    row_bytes = lane_h * itemsize

    # ---- tile sizing (see header comment) ----
    X_TILE_BYTES = 6 << 20        # per pipeline buffer: 2x-buffered x ~12 MiB
    MAX_TILE_ROWS = 8192          # keeps the (1, tile_m) f32 epilogue within the vreg file

    tile_m = max(8, X_TILE_BYTES // row_bytes)          # sized by bytes, not a row cap
    tile_m = min(tile_m, MAX_TILE_ROWS)
    # leave >= ~8 row tiles so the "parallel" grid axis can feed both v7x TensorCores
    tile_m = min(tile_m, max(128, _round_up(pl.cdiv(M, 8), 128)))
    if tile_m >= 128:
        tile_m = (tile_m // 128) * 128                  # lane-dense mask/out last dim
    else:
        tile_m = max(8, (tile_m // 8) * 8)
    if tile_m >= M:
        tile_m = M                                      # single full block, no partial edges

    n_tiles = pl.cdiv(M, tile_m)
    m_pad = n_tiles * tile_m

    # Mask is tiny (M floats): pad IT (not x) to the tile grid, lane-dense layout.
    mask_flat = mask_cls.astype(jnp.float32).reshape(M)
    if m_pad != M:
        mask_flat = jnp.pad(mask_flat, (0, m_pad - M))
    mask2d = mask_flat.reshape(n_tiles, tile_m)

    out = pl.pallas_call(
        _classifier_kernel,
        out_shape=jax.ShapeDtypeStruct((n_tiles, tile_m), jnp.float32),
        grid=(n_tiles,),
        in_specs=[
            pl.BlockSpec((tile_m, H), lambda i: (i, 0)),   # x: streamed row tiles (partial last block OK)
            pl.BlockSpec((1, H), lambda i: (0, 0)),        # weight: resident
            pl.BlockSpec((1, 1), lambda i: (0, 0)),        # bias: resident
            pl.BlockSpec((1, tile_m), lambda i: (i, 0)),   # mask: lane-dense rows
        ],
        out_specs=pl.BlockSpec((1, tile_m), lambda i: (i, 0)),
        compiler_params=pltpu.CompilerParams(
            dimension_semantics=("parallel",)),
        cost_estimate=pl.CostEstimate(
            flops=2 * M * H,
            transcendentals=M,
            bytes_accessed=M * row_bytes + 2 * m_pad * 4 + lane_h * itemsize),
    )(x_flat, w_row, b, mask2d)

    # Padded tail (stale-x rows x zero mask, possibly NaN) is dropped here.
    return out.reshape(-1)[:M].reshape(B, S)


def _reference(x, mask_cls, weight, bias):
    logits = jnp.einsum("bsh,h->bs", x.astype(jnp.float32),
                        weight[0].astype(jnp.float32)) + bias.astype(jnp.float32)[0]
    return jax.nn.sigmoid(logits) * mask_cls.astype(jnp.float32)


if __name__ == "__main__":
    key = jax.random.PRNGKey(0)
    kx, km, kw, kb, kx2, km2, kx3, km3 = jax.random.split(key, 8)

    H = 32
    bound = 1.0 / (H ** 0.5)
    weight = jax.random.uniform(kw, (1, H), minval=-bound, maxval=bound,
                                dtype=jnp.float32)
    bias = jax.random.uniform(kb, (1,), minval=-bound, maxval=bound,
                              dtype=jnp.float32)

    # ---- Case 1: f32, B=2, S=8 (single-block path, strict tolerance) ----
    B, S = 2, 8
    x = jax.random.normal(kx, (B, S, H), dtype=jnp.float32)
    mask_cls = (jax.random.uniform(km, (B, S)) > 0.25).astype(jnp.int32)
    scores = classifier_forward(x, mask_cls, weight, bias)
    jax.block_until_ready(scores)
    ref = _reference(x, mask_cls, weight, bias)
    assert scores.shape == (B, S)
    assert jnp.allclose(scores, ref, atol=1e-5), "case 1 (f32) mismatch"

    # ---- Case 2: bf16 activations, odd M = 15 (full-dim block) ----
    B2, S2 = 3, 5
    x2 = jax.random.normal(kx2, (B2, S2, H), dtype=jnp.float32).astype(jnp.bfloat16)
    mask2 = (jax.random.uniform(km2, (B2, S2)) > 0.25).astype(jnp.int32)
    scores2 = classifier_forward(x2, mask2, weight, bias)
    jax.block_until_ready(scores2)
    ref2 = _reference(x2, mask2, weight, bias)
    assert scores2.shape == (B2, S2)
    assert jnp.allclose(scores2, ref2, atol=5e-2), "case 2 (bf16) mismatch"

    # ---- Case 3: bf16, M=8000 -> multi-tile grid, partial last x block,
    #      padded mask, lane-dense (1, 1024) mask/out blocks ----
    B3, S3 = 4, 2000
    x3 = jax.random.normal(kx3, (B3, S3, H), dtype=jnp.float32).astype(jnp.bfloat16)
    mask3 = (jax.random.uniform(km3, (B3, S3)) > 0.25).astype(jnp.int32)
    scores3 = classifier_forward(x3, mask3, weight, bias)
    jax.block_until_ready(scores3)
    ref3 = _reference(x3, mask3, weight, bias)
    assert scores3.shape == (B3, S3)
    assert jnp.allclose(scores3, ref3, atol=5e-2), "case 3 (bf16, tiled) mismatch"

    print("KERNEL_OK")
</pallas_src>

<mosaic_0001>
module attributes {stable_mosaic.version = 11 : i64} {
  func.func @_classifier_kernel(%arg0: i32, %arg1: memref<16x32xf32, #tpu.memory_space<vmem>>, %arg2: memref<1x32xf32, #tpu.memory_space<vmem>>, %arg3: memref<1x1xf32, #tpu.memory_space<vmem>>, %arg4: memref<1x16xf32, #tpu.memory_space<vmem>>, %arg5: memref<1x16xf32, #tpu.memory_space<vmem>>) attributes {dimension_semantics = [#tpu.dimension_semantics<parallel>], iteration_bounds = array<i64: 1>, scalar_prefetch = 0 : i64, scratch_operands = 0 : i64, tpu.core_type = #tpu.core_type<tc>, window_params = [{transform_indices = @transform_0, window_bounds = array<i64: 16, 32>}, {pipeline_mode = #tpu.pipeline_mode<synchronous>, transform_indices = @transform_1, window_bounds = array<i64: 1, 32>}, {pipeline_mode = #tpu.pipeline_mode<synchronous>, transform_indices = @transform_2, window_bounds = array<i64: 1, 1>}, {transform_indices = @transform_3, window_bounds = array<i64: 1, 16>}, {transform_indices = @transform_4, window_bounds = array<i64: 1, 16>}]} {
    %c0 = arith.constant 0 : index
    %c0_0 = arith.constant 0 : index
    %0 = vector.load %arg2[%c0, %c0_0] : memref<1x32xf32, #tpu.memory_space<vmem>>, vector<1x32xf32>
    %c0_1 = arith.constant 0 : index
    %c0_2 = arith.constant 0 : index
    %1 = vector.load %arg1[%c0_1, %c0_2] : memref<16x32xf32, #tpu.memory_space<vmem>>, vector<16x32xf32>
    %cst = arith.constant dense<0.000000e+00> : vector<1x16xf32>
    %2 = tpu.matmul %0, %1, %cst {dimension_numbers = #tpu.dot_dimension_numbers<[1], [1], [0], [0], [0, 0, 1, 0], [], []>} : vector<1x32xf32>, vector<16x32xf32>, vector<1x16xf32> -> vector<1x16xf32>
    %c0_3 = arith.constant 0 : index
    %c0_4 = arith.constant 0 : index
    %3 = vector.load %arg3[%c0_3, %c0_4] : memref<1x1xf32, #tpu.memory_space<vmem>>, vector<1x1xf32>
    %4 = vector.broadcast %3 : vector<1x1xf32> to vector<1x16xf32>
    %5 = arith.addf %2, %4 : vector<1x16xf32>
    %6 = arith.negf %5 : vector<1x16xf32>
    %7 = math.exp %6 : vector<1x16xf32>
    %cst_5 = arith.constant 1.000000e+00 : f32
    %8 = vector.broadcast %cst_5 : f32 to vector<1x16xf32>
    %9 = arith.addf %8, %7 : vector<1x16xf32>
    %10 = arith.divf %8, %9 : vector<1x16xf32>
    %c0_6 = arith.constant 0 : index
    %c0_7 = arith.constant 0 : index
    %11 = vector.load %arg4[%c0_6, %c0_7] : memref<1x16xf32, #tpu.memory_space<vmem>>, vector<1x16xf32>
    %12 = arith.mulf %10, %11 : vector<1x16xf32>
    %c0_8 = arith.constant 0 : index
    %c0_9 = arith.constant 0 : index
    %13 = vector.load %arg5[%c0_8, %c0_9] : memref<1x16xf32, #tpu.memory_space<vmem>>, vector<1x16xf32>
    tpu.vector_store %arg5[%c0_8, %c0_9], %12 {strides = array<i32>} : memref<1x16xf32, #tpu.memory_space<vmem>>, vector<1x16xf32>,
    return
  }
  func.func @transform_0(%arg0: i32) -> (i32, i32) {
    %c0_i32 = arith.constant 0 : i32
    %c0_i32_0 = arith.constant 0 : i32
    return %arg0, %c0_i32 : i32, i32
  }
  func.func @transform_1(%arg0: i32) -> (i32, i32) {
    %c0_i32 = arith.constant 0 : i32
    %c0_i32_0 = arith.constant 0 : i32
    %c0_i32_1 = arith.constant 0 : i32
    return %c0_i32, %c0_i32_0 : i32, i32
  }
  func.func @transform_2(%arg0: i32) -> (i32, i32) {
    %c0_i32 = arith.constant 0 : i32
    %c0_i32_0 = arith.constant 0 : i32
    %c0_i32_1 = arith.constant 0 : i32
    return %c0_i32, %c0_i32_0 : i32, i32
  }
  func.func @transform_3(%arg0: i32) -> (i32, i32) {
    %c0_i32 = arith.constant 0 : i32
    %c0_i32_0 = arith.constant 0 : i32
    return %arg0, %c0_i32 : i32, i32
  }
  func.func @transform_4(%arg0: i32) -> (i32, i32) {
    %c0_i32 = arith.constant 0 : i32
    %c0_i32_0 = arith.constant 0 : i32
    return %arg0, %c0_i32 : i32, i32
  }
}

</mosaic_0001>

<bundles_post_ra>
// kernel: tpu_custom_call.1
= control target key start
LH: loop header
LB: loop body
LE: loop exit
PB: predicated region body
PF: predicated region fallthrough
CT: control target
= control target key end

     0   :  { %s269_s0 = inlined_call_operand.hbm [shape: f32[16,32], index: 0, kind: input, shape index: {}]   ;;  %s270_s1 = inlined_call_operand.vmem [shape: f32[1,32], index: 1, kind: input, shape index: {}]   ;;  %s271_s2 = inlined_call_operand.<no memory space> [shape: f32[1,1], index: 2, kind: input, shape index: {}]   ;;  %s272_s3 = inlined_call_operand.vmem [shape: f32[1,16], index: 3, kind: input, shape index: {}]   ;;  %s273_s4 = inlined_call_operand.hbm [shape: f32[1,16], index: 4, kind: output, shape index: {}]  }
   0x1   :  { %v9_v0 = vstv %s271_s2 }
   0x2   :  { %10 = vst [vmem:[#allocation2] sm:$0x1] %v9_v0 }
   0x3   :  { %11 = vsyncpa [#allocation4], 0 }
   0x4   :  { %12 = vsyncpa [#allocation5], 0  ;;  %s222_s17 = smov [#allocation3]  }
   0x5   :  { %s18_s18 = sshll.u32 %s222_s17, 4  ;;  %s19_s18 = int_to_ptr.vmem [resolvable:$true] %s18_s18 }
   0x6   :  { %s186_s19 = scalar_lea.vmem %s19_s18, 256  ;;  %p191_p1 = scmp.lt.s32.totalorder %s19_s18, %s19_s18 }
   0x7   :  { %p187_p0 = scmp.ne.s32.totalorder %s19_s18, %s186_s19  ;;  %p192_p2 = scmp.lt.s32.totalorder %s186_s19, %s186_s19 }
   0x9   :  { %p193_p3 = por %p192_p2, %p191_p1 }
   0xb   :  { %p194_p4 = pnand %p193_p3, %p187_p0 }
   0xd   :  { %197 = shalt.err (!%p194_p4)
}
   0xe   :  { %s223_s20 = smov 128   ;;  %s224_s21 = smov 8  }
   0xf   :  { %24 = dma.hbm_to_vmem [thread:$0]  %s269_s0, 256, %s19_s18, [#allocation4], %s223_s20, %s223_s20, %s224_s21  }
  0x10   :  { %218 = dma.done.wait [#allocation4], 256  }
  0x11   :  { %219 = vsyncadd [#allocation4], 4294967040  ;;  %v225_v1 = vmov 0.0   ;;  %vm226_vm0 = vmmov 0   ;;  %v227_v2 = vmov 0   ;;  %vm47_vm1 = vcmask 261120  }
  0x12   :  { %159 = vmatprep.subr.mxu0 %v225_v1  ;;  %163 = vmatprep.mubr.msk.f32.mxu0 %vm226_vm0, %v225_v1  ;;  %v36_v3 = vld [vmem:[#allocation3 + $0x8] sm:$0xff]  ;;  %v37_v4 = vld [vmem:[#allocation2] sm:$0x1]  ;;  %v35_v5 = vld [vmem:[#allocation3] sm:$0xff]  ;;  %v43_v7 = vlaneseq  ;;  %s228_s26 = smov [#allocation6]   ;;  %vm135_vm2 = vcmask 122880  }
  0x13   :  { %173 = vset.pattern.permute.xlu0 %v227_v2  ;;  %160 = vmatpush3.xpose.msk.msra.mxu0 %vm47_vm1, %v36_v3  ;;  %v34_v6 = vld [vmem:[%s270_s1] sm:$0x1]  ;;  %s143_s1 = sshll.u32 %s228_s26, 4  ;;  %s144_s1 = int_to_ptr.vmem [resolvable:$true] %s143_s1 }
  0x14   :  { %161 = vmatprep.subr.mxu0 %v225_v1  ;;  %40 = vperm.xlu0 %173, %v37_v4   ;;  %v44_v8 = vshrl.u32 %v43_v7, 7  ;;  %v133_v18 = vld [vmem:[%s272_s3] sm:$0x1]  ;;  %s198_s27 = scalar_lea.vmem %s144_s1, 16  ;;  %s202_s28 = scalar_lea.vmem %s144_s1, 32 }
  0x15   :  { %p199_p5 = scmp.ne.s32.totalorder %s144_s1, %s198_s27  ;;  %p203_p6 = scmp.lt.s32.totalorder %s144_s1, %s144_s1 }
  0x16   :  { %v45_v9 = vsub.s32 0, %v44_v8  ;;  %p204_p7 = scmp.lt.s32.totalorder %s202_s28, %s198_s27 }
  0x17   :  { %162 = vmatpush3.xpose.msk.msra.mxu0 %vm47_vm1, %v35_v5 }
  0x18   :  { %p205_p8 = por %p204_p7, %p203_p6 }
  0x1a   :  { %164 = vmatmul.mubr.msk.f32.vlgmr.msra.gmra.mxu0 %vm47_vm1, %v34_v6  ;;  %p206_p9 = pnand %p205_p8, %p199_p5 }
  0x8f   :  { %v41_v10 = vpop.permute.xlu0 %40 }
  0x90   :  { %v46_v11 = vrot.slane %v41_v10, %v45_v9 }
  0xda   :  { %v123_v12 = vpop.f32.mrf.mxu0 }
  0xdb   :  { %v124_v13 = vadd.f32 %v123_v12, %v46_v11 }
  0xdc   :  { %v165_v14 = vpop.f32.mrf.mxu0 }
  0xdd   :  { %v155_v15 = vmul.f32 -1.442695, %v124_v13 }
  0xdf   :  { %174 = vpow2.f32 %v155_v15 }
  0xec   :  { %v175_v16 = vpop.eup %174 }
  0xed   :  { %v130_v17 = vadd.f32 1.0, %v175_v16 }
  0xef   :  { %176 = vrcp.f32 %v130_v17 }
  0xfc   :  { %v177_v19 = vpop.eup %176 }
  0xfd   :  { %v134_v20 = vmul.f32 %v177_v19, %v133_v18 }
  0xff   :  { %136 = vst.msk [vmem:[#allocation6] sm:$0x1] %vm135_vm2, %v134_v20 }
 0x100   :  { %209 = shalt.err (!%p206_p9)
}
 0x101   :  { %146 = dma.vmem_to_hbm [thread:$0]  %s144_s1, 16, %s273_s4, [#allocation5]  }
 0x102   :  { %220 = dma.done.wait [#allocation5], 16  }
 0x103   :  { %221 = vsyncadd [#allocation5], 4294967280 }
 0x104   :  { %150 = vsyncpa [#allocation4], 1 }
 0x105   :  { %151 = vsyncpa [#allocation5], 1 }

</bundles_post_ra>
